<compile_context>
chip_gen: v6e
topology: v6e:2x2x1
jax: 0.10.0
libtpu: 0.0.40
codegen_flags: <defaults>
</compile_context>

<pallas_src>
import jax
import jax.numpy as jnp
from jax.experimental import pallas as pl
from jax.experimental.pallas import tpu as pltpu


def _round_up(x, m):
    return ((x + m - 1) // m) * m


def _pick_tile(dim, max_tile):
    """Lane/contract tile: multiple of 256 (128 floor), minimizing padding."""
    if dim <= 128:
        return 128
    hi = min(max_tile, _round_up(dim, 256))
    cands = list(range(256, hi + 1, 256))
    return min(cands, key=lambda c: (_round_up(dim, c), -c))


def _pick_tm(batch, max_tm=512):
    """Batch tile: multiple of 8, minimizing over-padding of ragged batches."""
    if batch <= 64:
        return min(_round_up(batch, 8), 64)
    cands = [c for c in (64, 128, 256, 512) if c <= max_tm]
    return min(cands, key=lambda c: (_round_up(batch, c), -c))


def _linear_kernel(x_ref, w_ref, b_ref, o_ref, acc_ref):
    # x_ref: (tm, tk)  w_ref: (tk, tn)  b_ref: (1, tn) f32
    # o_ref: (tm, tn)  acc_ref: (tm, tn) f32 scratch
    k = pl.program_id(2)

    @pl.when(k == 0)
    def _():
        acc_ref[...] = jnp.zeros_like(acc_ref)

    # Plain (M,K)x(K,N) contraction — weight is already K-major, no transpose.
    acc_ref[...] += jnp.dot(
        x_ref[...], w_ref[...], preferred_element_type=jnp.float32
    )

    @pl.when(k == pl.num_programs(2) - 1)
    def _():
        o_ref[...] = (acc_ref[...] + b_ref[...]).astype(o_ref.dtype)


def prepare_linear_params(weight, bias, *, compute_dtype=jnp.bfloat16,
                          tn=1024, tk=1024):
    """One-time parameter prep (do at init, NOT per forward call).

    Transposes W to K-major (indim, outdim), pads to tile multiples, and casts
    to the compute dtype, so the per-call hot path never copies the weight.
    """
    outdim, indim = weight.shape
    assert bias.shape == (outdim,)

    tk = _pick_tile(indim, tk)
    tn = _pick_tile(outdim, tn)
    # Guarantee >=2 tiles along a parallel grid axis for small-batch calls so
    # both v7x TensorCores (megacore) get work.
    if _round_up(outdim, tn) // tn < 2 and tn >= 512:
        tn //= 2

    Kp = _round_up(indim, tk)
    Np = _round_up(outdim, tn)

    w_t = jnp.asarray(weight).T.astype(compute_dtype)       # (indim, outdim)
    if (Kp, Np) != (indim, outdim):
        w_t = jnp.pad(w_t, ((0, Kp - indim), (0, Np - outdim)))
    b_p = jnp.asarray(bias, jnp.float32)
    if Np != outdim:
        b_p = jnp.pad(b_p, (0, Np - outdim))
    b_p = b_p.reshape(1, Np)

    return dict(w=w_t, b=b_p, indim=indim, outdim=outdim,
                Kp=Kp, Np=Np, tk=tk, tn=tn, compute_dtype=compute_dtype)


def fully_connect_forward(x, params, *, tm=512):
    """Pallas forward of nn.Linear: y = x @ W.T + b (f32 output)."""
    B, indim = x.shape
    assert indim == params["indim"]
    tk, tn = params["tk"], params["tn"]
    Kp, Np = params["Kp"], params["Np"]
    cdt = params["compute_dtype"]
    itemsize = jnp.dtype(cdt).itemsize

    tm = _pick_tm(B, tm)
    Bp = _round_up(B, tm)

    x_p = x.astype(cdt)
    if (Bp, Kp) != (B, indim):
        x_p = jnp.pad(x_p, ((0, Bp - B), (0, Kp - indim)))

    grid = (Bp // tm, Np // tn, Kp // tk)
    gm, gn, _ = grid

    cost = pl.CostEstimate(
        flops=2 * Bp * Kp * Np,
        transcendentals=0,
        # x is re-streamed per N tile, W per M tile.
        bytes_accessed=itemsize * (gn * Bp * Kp + gm * Kp * Np) + 4 * Bp * Np,
    )

    # Double-buffered working set + f32 accumulator (+ headroom).
    need = 2 * (tm * tk * itemsize + tk * tn * itemsize + tm * tn * 4) \
        + tm * tn * 4 + 2 * Np * 4
    vmem_limit = int(min(48 * 2**20, max(32 * 2**20, int(need * 1.5))))

    out = pl.pallas_call(
        _linear_kernel,
        out_shape=jax.ShapeDtypeStruct((Bp, Np), jnp.float32),
        grid=grid,
        in_specs=[
            pl.BlockSpec((tm, tk), lambda i, j, k: (i, k)),   # x tile
            pl.BlockSpec((tk, tn), lambda i, j, k: (k, j)),   # W (K-major) tile
            pl.BlockSpec((1, tn), lambda i, j, k: (0, j)),    # bias tile
        ],
        out_specs=pl.BlockSpec((tm, tn), lambda i, j, k: (i, j)),
        scratch_shapes=[pltpu.VMEM((tm, tn), jnp.float32)],
        compiler_params=pltpu.CompilerParams(
            dimension_semantics=("parallel", "parallel", "arbitrary"),
            vmem_limit_bytes=vmem_limit,
        ),
        cost_estimate=cost,
    )(x_p, params["w"], params["b"])

    if (Bp, Np) != (B, params["outdim"]):
        out = out[:B, :params["outdim"]]
    return out


if __name__ == "__main__":
    key = jax.random.PRNGKey(0)
    k_x, k_w, k_b = jax.random.split(key, 3)

    # Small shapes matching the module defaults (indim=outdim=64).
    B, indim, outdim = 8, 64, 64
    bound = 1.0 / (indim ** 0.5)
    x = jax.random.normal(k_x, (B, indim), dtype=jnp.float32)
    weight = jax.random.uniform(k_w, (outdim, indim), jnp.float32, -bound, bound)
    bias = jax.random.uniform(k_b, (outdim,), jnp.float32, -bound, bound)

    y_ref = x @ weight.T + bias

    # f32 compute path — tight tolerance vs the plain-JAX reference.
    params_f32 = prepare_linear_params(weight, bias, compute_dtype=jnp.float32)
    fwd_f32 = jax.jit(lambda xx: fully_connect_forward(xx, params_f32))
    y32 = jax.block_until_ready(fwd_f32(x))
    assert y32.shape == (B, outdim)
    assert jnp.allclose(y32, y_ref, atol=1e-5, rtol=1e-5)

    # bf16-operand / f32-accumulate path (TPU MXU performance default).
    params_bf16 = prepare_linear_params(weight, bias, compute_dtype=jnp.bfloat16)
    fwd_bf16 = jax.jit(lambda xx: fully_connect_forward(xx, params_bf16))
    y16 = jax.block_until_ready(fwd_bf16(x))
    assert y16.shape == (B, outdim)
    assert jnp.allclose(y16, y_ref, atol=2e-2, rtol=2e-2)

    print("KERNEL_OK")
</pallas_src>

<mosaic_0001>
module attributes {stable_mosaic.version = 11 : i64} {
  func.func @_linear_kernel(%arg0: i32, %arg1: i32, %arg2: i32, %arg3: memref<8x128xf32, #tpu.memory_space<vmem>>, %arg4: memref<128x128xf32, #tpu.memory_space<vmem>>, %arg5: memref<1x128xf32, #tpu.memory_space<vmem>>, %arg6: memref<8x128xf32, #tpu.memory_space<vmem>>, %arg7: memref<8x128xf32, #tpu.memory_space<vmem>>) attributes {dimension_semantics = [#tpu.dimension_semantics<parallel>, #tpu.dimension_semantics<parallel>, #tpu.dimension_semantics<arbitrary>], iteration_bounds = array<i64: 1, 1, 1>, scalar_prefetch = 0 : i64, scratch_operands = 1 : i64, tpu.core_type = #tpu.core_type<tc>, window_params = [{transform_indices = @transform_0, window_bounds = array<i64: 8, 128>}, {transform_indices = @transform_1, window_bounds = array<i64: 128, 128>}, {transform_indices = @transform_2, window_bounds = array<i64: 1, 128>}, {transform_indices = @transform_3, window_bounds = array<i64: 8, 128>}]} {
    %c0_i32 = arith.constant 0 : i32
    %0 = arith.cmpi eq, %arg2, %c0_i32 : i32
    %1 = arith.extui %0 : i1 to i32
    %c0_i32_0 = arith.constant 0 : i32
    %2 = arith.cmpi ne, %1, %c0_i32_0 : i32
    scf.if %2 {
      %cst_10 = arith.constant 0.000000e+00 : f32
      %12 = vector.broadcast %cst_10 : f32 to vector<8x128xf32>
      %c0_11 = arith.constant 0 : index
      %c0_12 = arith.constant 0 : index
      %13 = vector.load %arg7[%c0_11, %c0_12] : memref<8x128xf32, #tpu.memory_space<vmem>>, vector<8x128xf32>
      tpu.vector_store %arg7[%c0_11, %c0_12], %12 {strides = array<i32>} : memref<8x128xf32, #tpu.memory_space<vmem>>, vector<8x128xf32>,
    } else {
    }
    %c0 = arith.constant 0 : index
    %c0_1 = arith.constant 0 : index
    %3 = vector.load %arg7[%c0, %c0_1] : memref<8x128xf32, #tpu.memory_space<vmem>>, vector<8x128xf32>
    %c0_2 = arith.constant 0 : index
    %c0_3 = arith.constant 0 : index
    %4 = vector.load %arg3[%c0_2, %c0_3] : memref<8x128xf32, #tpu.memory_space<vmem>>, vector<8x128xf32>
    %c0_4 = arith.constant 0 : index
    %c0_5 = arith.constant 0 : index
    %5 = vector.load %arg4[%c0_4, %c0_5] : memref<128x128xf32, #tpu.memory_space<vmem>>, vector<128x128xf32>
    %cst = arith.constant dense<0.000000e+00> : vector<8x128xf32>
    %6 = tpu.matmul %4, %5, %cst {dimension_numbers = #tpu.dot_dimension_numbers<[1], [0], [0], [1], [0, 0, 1, 1], [], []>} : vector<8x128xf32>, vector<128x128xf32>, vector<8x128xf32> -> vector<8x128xf32>
    %7 = arith.addf %3, %6 : vector<8x128xf32>
    %c0_6 = arith.constant 0 : index
    %c0_7 = arith.constant 0 : index
    %8 = vector.load %arg7[%c0_6, %c0_7] : memref<8x128xf32, #tpu.memory_space<vmem>>, vector<8x128xf32>
    tpu.vector_store %arg7[%c0_6, %c0_7], %7 {strides = array<i32>} : memref<8x128xf32, #tpu.memory_space<vmem>>, vector<8x128xf32>,
    %c0_i32_8 = arith.constant 0 : i32
    %9 = arith.cmpi eq, %arg2, %c0_i32_8 : i32
    %10 = arith.extui %9 : i1 to i32
    %c0_i32_9 = arith.constant 0 : i32
    %11 = arith.cmpi ne, %10, %c0_i32_9 : i32
    scf.if %11 {
      %c0_10 = arith.constant 0 : index
      %c0_11 = arith.constant 0 : index
      %12 = vector.load %arg7[%c0_10, %c0_11] : memref<8x128xf32, #tpu.memory_space<vmem>>, vector<8x128xf32>
      %c0_12 = arith.constant 0 : index
      %c0_13 = arith.constant 0 : index
      %13 = vector.load %arg5[%c0_12, %c0_13] : memref<1x128xf32, #tpu.memory_space<vmem>>, vector<1x128xf32>
      %14 = vector.broadcast %13 : vector<1x128xf32> to vector<8x128xf32>
      %15 = arith.addf %12, %14 : vector<8x128xf32>
      %c0_14 = arith.constant 0 : index
      %c0_15 = arith.constant 0 : index
      %16 = vector.load %arg6[%c0_14, %c0_15] : memref<8x128xf32, #tpu.memory_space<vmem>>, vector<8x128xf32>
      tpu.vector_store %arg6[%c0_14, %c0_15], %15 {strides = array<i32>} : memref<8x128xf32, #tpu.memory_space<vmem>>, vector<8x128xf32>,
    } else {
    }
    return
  }
  func.func @transform_0(%arg0: i32, %arg1: i32, %arg2: i32) -> (i32, i32) {
    %c0_i32 = arith.constant 0 : i32
    return %arg0, %arg2 : i32, i32
  }
  func.func @transform_1(%arg0: i32, %arg1: i32, %arg2: i32) -> (i32, i32) {
    %c0_i32 = arith.constant 0 : i32
    return %arg2, %arg1 : i32, i32
  }
  func.func @transform_2(%arg0: i32, %arg1: i32, %arg2: i32) -> (i32, i32) {
    %c0_i32 = arith.constant 0 : i32
    %c0_i32_0 = arith.constant 0 : i32
    return %c0_i32, %arg1 : i32, i32
  }
  func.func @transform_3(%arg0: i32, %arg1: i32, %arg2: i32) -> (i32, i32) {
    %c0_i32 = arith.constant 0 : i32
    return %arg0, %arg1 : i32, i32
  }
}

</mosaic_0001>

<bundles_post_ra>
// kernel: _lambda_.1
= control target key start
LH: loop header
LB: loop body
LE: loop exit
PB: predicated region body
PF: predicated region fallthrough
CT: control target
= control target key end

     0   :  { %8 = vsyncpa [#allocation4], 0  ;;  %s293_s0 = inlined_call_operand.vmem [shape: f32[8,128], index: 0, kind: input, shape index: {}]   ;;  %s294_s1 = inlined_call_operand.hbm [shape: f32[128,128], index: 1, kind: input, shape index: {}]   ;;  %s295_s2 = inlined_call_operand.vmem [shape: f32[1,128], index: 2, kind: input, shape index: {}]   ;;  %s296_s3 = inlined_call_operand.hbm [shape: f32[8,128], index: 3, kind: output, shape index: {}]  }
   0x1   :  { %9 = vsyncpa [#allocation5], 0  ;;  %s255_s12 = smov [#allocation3]  }
   0x2   :  { %s17_s13 = sshll.u32 %s255_s12, 4  ;;  %s18_s13 = int_to_ptr.vmem [resolvable:$true] %s17_s13 }
   0x3   :  { %s219_s14 = scalar_lea.vmem %s18_s13, 2048  ;;  %p224_p1 = scmp.lt.s32.totalorder %s18_s13, %s18_s13 }
   0x4   :  { %p220_p0 = scmp.ne.s32.totalorder %s18_s13, %s219_s14  ;;  %p225_p2 = scmp.lt.s32.totalorder %s219_s14, %s219_s14 }
   0x6   :  { %p226_p3 = por %p225_p2, %p224_p1 }
   0x8   :  { %p227_p4 = pnand %p226_p3, %p220_p0 }
   0xa   :  { %230 = shalt.err (!%p227_p4)
}
   0xb   :  { %s256_s15 = smov 128   ;;  %s257_s16 = smov 8  }
   0xc   :  { %23 = dma.hbm_to_vmem [thread:$0]  %s294_s1, 2048, %s18_s13, [#allocation4], %s256_s15, %s256_s15, %s257_s16  }
   0xd   :  { %251 = dma.done.wait [#allocation4], 2048  }
   0xe   :  { %252 = vsyncadd [#allocation4], 4294965248  ;;  %v258_v0 = vmov 0.0   ;;  %vm259_vm0 = vmmov 0   ;;  %v51_v1 = vld [vmem:[#allocation3 + $0x78] sm:$0xff]  ;;  %v50_v2 = vld [vmem:[#allocation3 + $0x70] sm:$0xff] }
   0xf   :  { %170 = vmatprep.subr.mxu0 %v258_v0  ;;  %202 = vmatprep.mubr.msk.f32.mxu0 %vm259_vm0, %v258_v0  ;;  %v49_v3 = vld [vmem:[#allocation3 + $0x68] sm:$0xff]  ;;  %v48_v4 = vld [vmem:[#allocation3 + $0x60] sm:$0xff]  ;;  %v47_v5 = vld [vmem:[#allocation3 + $0x58] sm:$0xff]  ;;  %s260_s22 = smov [#allocation6]  }
  0x10   :  { %171 = vmatpush3.msra.mxu0 %v51_v1  ;;  %v46_v6 = vld [vmem:[#allocation3 + $0x50] sm:$0xff]  ;;  %v45_v7 = vld [vmem:[#allocation3 + $0x48] sm:$0xff]  ;;  %v44_v8 = vld [vmem:[#allocation3 + $0x40] sm:$0xff]  ;;  %s143_s23 = sshll.u32 %s260_s22, 4  ;;  %s144_s23 = int_to_ptr.vmem [resolvable:$true] %s143_s23 }
  0x11   :  { %172 = vmatprep.subr.mxu0 %v258_v0  ;;  %v43_v9 = vld [vmem:[#allocation3 + $0x38] sm:$0xff]  ;;  %v42_v10 = vld [vmem:[#allocation3 + $0x30] sm:$0xff]  ;;  %v41_v11 = vld [vmem:[#allocation3 + $0x28] sm:$0xff]  ;;  %s231_s24 = scalar_lea.vmem %s144_s23, 128  ;;  %p236_p6 = scmp.lt.s32.totalorder %s144_s23, %s144_s23 }
  0x12   :  { %173 = vmatpush3.msra.mxu0 %v50_v2  ;;  %v40_v12 = vld [vmem:[#allocation3 + $0x20] sm:$0xff]  ;;  %v39_v13 = vld [vmem:[#allocation3 + $0x18] sm:$0xff]  ;;  %v38_v14 = vld [vmem:[#allocation3 + $0x10] sm:$0xff]  ;;  %p232_p5 = scmp.ne.s32.totalorder %s144_s23, %s231_s24  ;;  %p237_p7 = scmp.lt.s32.totalorder %s231_s24, %s231_s24 }
  0x13   :  { %174 = vmatprep.subr.mxu0 %v258_v0  ;;  %v37_v15 = vld [vmem:[#allocation3 + $0x8] sm:$0xff]  ;;  %v36_v16 = vld [vmem:[#allocation3] sm:$0xff] }
  0x14   :  { %175 = vmatpush3.msra.mxu0 %v49_v3  ;;  %v35_v17 = vld [vmem:[%s293_s0] sm:$0xff]  ;;  %p238_p8 = por %p237_p7, %p236_p6 }
  0x15   :  { %176 = vmatprep.subr.mxu0 %v258_v0  ;;  %v152_v18 = vld [vmem:[%s295_s2] ss:$0 sm:$0xff] }
  0x16   :  { %177 = vmatpush3.msra.mxu0 %v48_v4  ;;  %p239_p9 = pnand %p238_p8, %p232_p5 }
  0x17   :  { %178 = vmatprep.subr.mxu0 %v258_v0 }
  0x18   :  { %179 = vmatpush3.msra.mxu0 %v47_v5 }
  0x19   :  { %180 = vmatprep.subr.mxu0 %v258_v0 }
  0x1a   :  { %181 = vmatpush3.msra.mxu0 %v46_v6 }
  0x1b   :  { %182 = vmatprep.subr.mxu0 %v258_v0 }
  0x1c   :  { %183 = vmatpush3.msra.mxu0 %v45_v7 }
  0x1d   :  { %184 = vmatprep.subr.mxu0 %v258_v0 }
  0x1e   :  { %185 = vmatpush3.msra.mxu0 %v44_v8 }
  0x1f   :  { %186 = vmatprep.subr.mxu0 %v258_v0 }
  0x20   :  { %187 = vmatpush3.msra.mxu0 %v43_v9 }
  0x21   :  { %188 = vmatprep.subr.mxu0 %v258_v0 }
  0x22   :  { %189 = vmatpush3.msra.mxu0 %v42_v10 }
  0x23   :  { %190 = vmatprep.subr.mxu0 %v258_v0 }
  0x24   :  { %191 = vmatpush3.msra.mxu0 %v41_v11 }
  0x25   :  { %192 = vmatprep.subr.mxu0 %v258_v0 }
  0x26   :  { %193 = vmatpush3.msra.mxu0 %v40_v12 }
  0x27   :  { %194 = vmatprep.subr.mxu0 %v258_v0 }
  0x28   :  { %195 = vmatpush3.msra.mxu0 %v39_v13 }
  0x29   :  { %196 = vmatprep.subr.mxu0 %v258_v0 }
  0x2a   :  { %197 = vmatpush3.msra.mxu0 %v38_v14 }
  0x2b   :  { %198 = vmatprep.subr.mxu0 %v258_v0 }
  0x2c   :  { %199 = vmatpush3.msra.mxu0 %v37_v15 }
  0x2d   :  { %200 = vmatprep.subr.mxu0 %v258_v0 }
  0x2e   :  { %201 = vmatpush3.msra.mxu0 %v36_v16 }
  0x2f   :  { %203 = vmatmul.mubr.f32.vlgmr.msra.gmra.mxu0 %v35_v17 }
  0xef   :  { %v118_v19 = vpop.f32.mrf.mxu0 }
  0xf0   :  { %v135_v20 = vadd.f32 %v152_v18, %v118_v19 }
  0xf1   :  { %v204_v21 = vpop.f32.mrf.mxu0 }
  0xf2   :  { %136 = vst [vmem:[#allocation6] sm:$0xff] %v135_v20 }
  0xf3   :  { %242 = shalt.err (!%p239_p9)
}
  0xf4   :  { %146 = dma.vmem_to_hbm [thread:$0]  %s144_s23, 128, %s296_s3, [#allocation5]  }
  0xf5   :  { %253 = dma.done.wait [#allocation5], 128  }
  0xf6   :  { %254 = vsyncadd [#allocation5], 4294967168 }
  0xf7   :  { %150 = vsyncpa [#allocation4], 1 }
  0xf8   :  { %151 = vsyncpa [#allocation5], 1 }

</bundles_post_ra>
